<compile_context>
chip_gen: v6e
topology: v6e:2x2x1
jax: 0.10.0
libtpu: 0.0.40
codegen_flags: <defaults>
</compile_context>

<pallas_src>
import functools

import jax
import jax.numpy as jnp
from jax.experimental import pallas as pl
from jax.experimental.pallas import tpu as pltpu


def _layernorm_kernel(x_ref, gamma_ref, bias_ref, o_ref, *, eps):
    # x_ref: (tile_rows, d_model); gamma_ref/bias_ref: (1, d_model)
    x = x_ref[...].astype(jnp.float32)
    d = x.shape[-1]
    inv_d = jnp.float32(1.0 / d)

    # Fused single-pass statistics: one sweep over x produces both sum and
    # sum-of-squares (halves the XLU reduction work vs mean-then-centered-var).
    s1 = jnp.sum(x, axis=-1, keepdims=True)
    s2 = jnp.sum(x * x, axis=-1, keepdims=True)
    mean = s1 * inv_d
    # Unbiased (N-1) variance to match torch.std default; clamp vs rounding.
    var = jnp.maximum(s2 - s1 * mean, 0.0) / jnp.float32(d - 1)
    std = jnp.sqrt(var)

    # Reciprocal over the narrow (tr, 1) column, then a broadcast multiply,
    # instead of a full (tr, d_model) divide on the VALU.
    inv = pl.reciprocal(std + jnp.float32(eps), approx=False)

    g = gamma_ref[...].astype(jnp.float32)
    b = bias_ref[...].astype(jnp.float32)
    y = g * ((x - mean) * inv) + b
    o_ref[...] = y.astype(o_ref.dtype)


def _choose_tile_rows(rows, d_model, itemsize):
    """Largest multiple-of-8 row tile that keeps the working set in VMEM.

    Working set per grid step ~= 2 (double buffer) * (in + out) tile in the
    native dtype + a couple of fp32 compute temporaries of the same tile.
    Budget is conservative so the same tile fits v7x (64 MiB physical) as well
    as v5e/v6e (128 MiB).
    """
    budget_bytes = 24 * 1024 * 1024
    per_row_bytes = d_model * (4 * itemsize + 2 * 4)
    tr = budget_bytes // max(per_row_bytes, 1)
    tr = max(8, min(1024, (tr // 8) * 8))
    # Don't use a tile bigger than the (8-padded) row count.
    tr = min(tr, pl.cdiv(rows, 8) * 8)
    return max(tr, 8)


def layer_normalization(x, gamma, bias, eps=1e-6):
    """LayerNormalization forward. x: (..., d_model); gamma, bias: (d_model,)."""
    orig_shape = x.shape
    d_model = orig_shape[-1]
    assert d_model > 1, "d_model must be > 1 (unbiased std divides by N-1)"

    rows = 1
    for s in orig_shape[:-1]:
        rows *= s
    x2 = x.reshape(rows, d_model)
    gamma2 = gamma.reshape(1, d_model)
    bias2 = bias.reshape(1, d_model)

    tr = _choose_tile_rows(rows, d_model, jnp.dtype(x.dtype).itemsize)

    # Pad rows up to a multiple of the tile (keeps (8,128)-aligned sublane
    # tiles and unmasked row traffic) and slice the tail off afterwards.
    num_tiles = pl.cdiv(rows, tr)
    rows_pad = num_tiles * tr
    if rows_pad != rows:
        x2 = jnp.pad(x2, ((0, rows_pad - rows), (0, 0)))

    grid = (num_tiles,)
    out = pl.pallas_call(
        functools.partial(_layernorm_kernel, eps=eps),
        out_shape=jax.ShapeDtypeStruct((rows_pad, d_model), x.dtype),
        grid_spec=pltpu.PrefetchScalarGridSpec(
            num_scalar_prefetch=0,
            grid=grid,
            in_specs=[
                pl.BlockSpec((tr, d_model), lambda i: (i, 0)),
                pl.BlockSpec((1, d_model), lambda i: (0, 0)),
                pl.BlockSpec((1, d_model), lambda i: (0, 0)),
            ],
            out_specs=pl.BlockSpec((tr, d_model), lambda i: (i, 0)),
        ),
        compiler_params=pltpu.CompilerParams(
            # Row tiles are independent -> shard across TensorCores (2x on v7x).
            dimension_semantics=("parallel",),
            # Raise the scoped VMEM limit so the large double-buffered tiles fit
            # on v5e/v6e (16/32 MiB defaults) while staying under v7x's 64 MiB.
            vmem_limit_bytes=48 * 1024 * 1024,
        ),
    )(x2, gamma2, bias2)

    if rows_pad != rows:
        out = out[:rows]
    return out.reshape(orig_shape)


if __name__ == "__main__":
    # Module init: gamma = ones(d_model), bias = zeros(d_model)
    batch, seq, d_model = 2, 8, 32
    eps = 1e-6

    key = jax.random.PRNGKey(0)
    x = jax.random.normal(key, (batch, seq, d_model), dtype=jnp.float32)
    gamma = jnp.ones((d_model,), dtype=jnp.float32)
    bias = jnp.zeros((d_model,), dtype=jnp.float32)

    out = layer_normalization(x, gamma, bias, eps=eps)
    out = jax.block_until_ready(out)

    # Reference in plain JAX (unbiased std, eps added to std).
    mean = jnp.mean(x, axis=-1, keepdims=True)
    std = jnp.std(x, axis=-1, keepdims=True, ddof=1)
    ref = gamma * ((x - mean) / (std + eps)) + bias
    assert jnp.allclose(out, ref, atol=1e-5, rtol=1e-5), "mismatch vs reference"

    print("KERNEL_OK")
</pallas_src>

<mosaic_0001>
module attributes {stable_mosaic.version = 11 : i64} {
  func.func @_layernorm_kernel(%arg0: i32, %arg1: memref<16x32xf32, #tpu.memory_space<vmem>>, %arg2: memref<1x32xf32, #tpu.memory_space<vmem>>, %arg3: memref<1x32xf32, #tpu.memory_space<vmem>>, %arg4: memref<16x32xf32, #tpu.memory_space<vmem>>) attributes {dimension_semantics = [#tpu.dimension_semantics<parallel>], iteration_bounds = array<i64: 1>, scalar_prefetch = 0 : i64, scratch_operands = 0 : i64, tpu.core_type = #tpu.core_type<tc>, window_params = [{transform_indices = @transform_0, window_bounds = array<i64: 16, 32>}, {pipeline_mode = #tpu.pipeline_mode<synchronous>, transform_indices = @transform_1, window_bounds = array<i64: 1, 32>}, {pipeline_mode = #tpu.pipeline_mode<synchronous>, transform_indices = @transform_2, window_bounds = array<i64: 1, 32>}, {transform_indices = @transform_3, window_bounds = array<i64: 16, 32>}]} {
    %c0 = arith.constant 0 : index
    %c0_0 = arith.constant 0 : index
    %0 = vector.load %arg1[%c0, %c0_0] : memref<16x32xf32, #tpu.memory_space<vmem>>, vector<16x32xf32>
    %cst = arith.constant dense<0.000000e+00> : vector<16xf32>
    %1 = vector.multi_reduction <add>, %0, %cst [1] : vector<16x32xf32> to vector<16xf32>
    %2 = vector.shape_cast %1 : vector<16xf32> to vector<16x1xf32>
    %3 = arith.mulf %0, %0 : vector<16x32xf32>
    %cst_1 = arith.constant dense<0.000000e+00> : vector<16xf32>
    %4 = vector.multi_reduction <add>, %3, %cst_1 [1] : vector<16x32xf32> to vector<16xf32>
    %5 = vector.shape_cast %4 : vector<16xf32> to vector<16x1xf32>
    %cst_2 = arith.constant 3.125000e-02 : f32
    %6 = vector.broadcast %cst_2 : f32 to vector<16x1xf32>
    %7 = arith.mulf %2, %6 : vector<16x1xf32>
    %8 = arith.mulf %2, %7 : vector<16x1xf32>
    %9 = arith.subf %5, %8 : vector<16x1xf32>
    %cst_3 = arith.constant 0.000000e+00 : f32
    %10 = vector.broadcast %cst_3 : f32 to vector<16x1xf32>
    %11 = arith.maximumf %9, %10 : vector<16x1xf32>
    %cst_4 = arith.constant 3.100000e+01 : f32
    %12 = vector.broadcast %cst_4 : f32 to vector<16x1xf32>
    %13 = arith.divf %11, %12 : vector<16x1xf32>
    %14 = math.sqrt %13 : vector<16x1xf32>
    %cst_5 = arith.constant 9.99999997E-7 : f32
    %15 = vector.broadcast %cst_5 : f32 to vector<16x1xf32>
    %16 = arith.addf %14, %15 : vector<16x1xf32>
    %17 = tpu.reciprocal %16 : vector<16x1xf32> -> vector<16x1xf32>
    %c0_6 = arith.constant 0 : index
    %c0_7 = arith.constant 0 : index
    %18 = vector.load %arg2[%c0_6, %c0_7] : memref<1x32xf32, #tpu.memory_space<vmem>>, vector<1x32xf32>
    %c0_8 = arith.constant 0 : index
    %c0_9 = arith.constant 0 : index
    %19 = vector.load %arg3[%c0_8, %c0_9] : memref<1x32xf32, #tpu.memory_space<vmem>>, vector<1x32xf32>
    %20 = vector.broadcast %7 : vector<16x1xf32> to vector<16x32xf32>
    %21 = arith.subf %0, %20 : vector<16x32xf32>
    %22 = vector.broadcast %17 : vector<16x1xf32> to vector<16x32xf32>
    %23 = arith.mulf %21, %22 : vector<16x32xf32>
    %24 = vector.broadcast %18 : vector<1x32xf32> to vector<16x32xf32>
    %25 = arith.mulf %24, %23 : vector<16x32xf32>
    %26 = vector.broadcast %19 : vector<1x32xf32> to vector<16x32xf32>
    %27 = arith.addf %25, %26 : vector<16x32xf32>
    %c0_10 = arith.constant 0 : index
    %c0_11 = arith.constant 0 : index
    %28 = vector.load %arg4[%c0_10, %c0_11] : memref<16x32xf32, #tpu.memory_space<vmem>>, vector<16x32xf32>
    tpu.vector_store %arg4[%c0_10, %c0_11], %27 {strides = array<i32>} : memref<16x32xf32, #tpu.memory_space<vmem>>, vector<16x32xf32>,
    return
  }
  func.func @transform_0(%arg0: i32) -> (i32, i32) {
    %c0_i32 = arith.constant 0 : i32
    %c0_i32_0 = arith.constant 0 : i32
    return %arg0, %c0_i32 : i32, i32
  }
  func.func @transform_1(%arg0: i32) -> (i32, i32) {
    %c0_i32 = arith.constant 0 : i32
    %c0_i32_0 = arith.constant 0 : i32
    %c0_i32_1 = arith.constant 0 : i32
    return %c0_i32, %c0_i32_0 : i32, i32
  }
  func.func @transform_2(%arg0: i32) -> (i32, i32) {
    %c0_i32 = arith.constant 0 : i32
    %c0_i32_0 = arith.constant 0 : i32
    %c0_i32_1 = arith.constant 0 : i32
    return %c0_i32, %c0_i32_0 : i32, i32
  }
  func.func @transform_3(%arg0: i32) -> (i32, i32) {
    %c0_i32 = arith.constant 0 : i32
    %c0_i32_0 = arith.constant 0 : i32
    return %arg0, %c0_i32 : i32, i32
  }
}

</mosaic_0001>

<bundles_post_ra>
// kernel: tpu_custom_call.1
= control target key start
LH: loop header
LB: loop body
LE: loop exit
PB: predicated region body
PF: predicated region fallthrough
CT: control target
= control target key end

     0   :  { %8 = vsyncpa [#allocation3], 0  ;;  %s222_s0 = inlined_call_operand.hbm [shape: f32[16,32], index: 0, kind: input, shape index: {}]   ;;  %s223_s1 = inlined_call_operand.vmem [shape: f32[1,32], index: 1, kind: input, shape index: {}]   ;;  %s224_s2 = inlined_call_operand.vmem [shape: f32[1,32], index: 2, kind: input, shape index: {}]   ;;  %s225_s3 = inlined_call_operand.hbm [shape: f32[16,32], index: 3, kind: output, shape index: {}]  }
   0x1   :  { %9 = vsyncpa [#allocation4], 0  ;;  %s174_s12 = smov [#allocation2]  }
   0x2   :  { %s15_s13 = sshll.u32 %s174_s12, 4  ;;  %s16_s13 = int_to_ptr.vmem [resolvable:$true] %s15_s13 }
   0x3   :  { %s138_s14 = scalar_lea.vmem %s16_s13, 256  ;;  %p143_p1 = scmp.lt.s32.totalorder %s16_s13, %s16_s13 }
   0x4   :  { %p139_p0 = scmp.ne.s32.totalorder %s16_s13, %s138_s14  ;;  %p144_p2 = scmp.lt.s32.totalorder %s138_s14, %s138_s14 }
   0x6   :  { %p145_p3 = por %p144_p2, %p143_p1 }
   0x8   :  { %p146_p4 = pnand %p145_p3, %p139_p0 }
   0xa   :  { %149 = shalt.err (!%p146_p4)
}
   0xb   :  { %s175_s15 = smov 128   ;;  %s176_s16 = smov 8  }
   0xc   :  { %21 = dma.hbm_to_vmem [thread:$0]  %s222_s0, 256, %s16_s13, [#allocation3], %s175_s15, %s175_s15, %s176_s16  }
   0xd   :  { %170 = dma.done.wait [#allocation3], 256  }
   0xe   :  { %171 = vsyncadd [#allocation3], 4294967040  ;;  %vm31_vm0 = vcmask 261120   ;;  %v29_v0 = vld [vmem:[#allocation2] sm:$0xff]  ;;  %v30_v1 = vld [vmem:[#allocation2 + $0x8] sm:$0xff]  ;;  %s177_s22 = smov [#allocation5]  }
   0xf   :  { %v32_v2 = vsel %vm31_vm0, %v29_v0, 0.0  ;;  %v38_v3 = vmul.f32 %v29_v0, %v29_v0  ;;  %v39_v4 = vmul.f32 %v30_v1, %v30_v1  ;;  %v35_v6 = vsel %vm31_vm0, %v30_v1, 0.0  ;;  %v116_v36 = vld [vmem:[%s223_s1] ss:$0 sm:$0xff]  ;;  %s104_s23 = sshll.u32 %s177_s22, 4  ;;  %s105_s23 = int_to_ptr.vmem [resolvable:$true] %s104_s23 }
  0x10   :  { %33 = vadd.xlane.f32.xlu0 %v32_v2  ;;  %v117_v38 = vld [vmem:[%s224_s2] ss:$0 sm:$0xff]  ;;  %s150_s1 = scalar_lea.vmem %s105_s23, 256  ;;  %p155_p6 = scmp.lt.s32.totalorder %s105_s23, %s105_s23 }
  0x11   :  { %v40_v5 = vsel %vm31_vm0, %v38_v3, 0.0  ;;  %v43_v7 = vsel %vm31_vm0, %v39_v4, 0.0  ;;  %p151_p5 = scmp.ne.s32.totalorder %s105_s23, %s150_s1  ;;  %p156_p7 = scmp.lt.s32.totalorder %s150_s1, %s150_s1 }
  0x12   :  { %41 = vadd.xlane.f32.xlu1 %v40_v5 }
  0x13   :  { %p157_p8 = por %p156_p7, %p155_p6 }
  0x14   :  { %36 = vadd.xlane.f32.xlu0 %v35_v6 }
  0x15   :  { %p158_p9 = pnand %p157_p8, %p151_p5 }
  0x16   :  { %44 = vadd.xlane.f32.xlu1 %v43_v7 }
  0x99   :  { %v34_v8 = vpop.xlane.xlu0 %33 }
  0x9a   :  { %v46_v9 = vmul.f32 0.03125, %v34_v8 }
  0x9b   :  { %v42_v10 = vpop.xlane.xlu1 %41 }
  0x9c   :  { %v48_v11 = vmul.f32 %v46_v9, %v34_v8  ;;  %v77_v34 = vsub.f32 %v29_v0, %v46_v9 }
  0x9d   :  { %v37_v12 = vpop.xlane.xlu0 %36 }
  0x9e   :  { %v50_v13 = vsub.f32 %v42_v10, %v48_v11  ;;  %v47_v14 = vmul.f32 0.03125, %v37_v12 }
  0x9f   :  { %v45_v15 = vpop.xlane.xlu1 %44 }
  0xa0   :  { %v52_v16 = vmax.f32 %v50_v13, 0.0  ;;  %v49_v17 = vmul.f32 %v47_v14, %v37_v12  ;;  %v78_v40 = vsub.f32 %v30_v1, %v47_v14 }
  0xa2   :  { %v55_v18 = vmul.f32 0.032258064, %v52_v16  ;;  %v51_v19 = vsub.f32 %v45_v15, %v49_v17 }
  0xa4   :  { %122 = vrsqrt.f32 %v55_v18  ;;  %v53_v20 = vmax.f32 %v51_v19, 0.0  ;;  %vm59_vm1 = vcmp.eq.f32.partialorder %v55_v18, inf  ;;  %v62_v24 = vand.u32 2147483648, %v55_v18 }
  0xa5   :  { %vm61_vm2 = vcmp.eq.f32.partialorder %v55_v18, 0.0 }
  0xa6   :  { %v56_v21 = vmul.f32 0.032258064, %v53_v20 }
  0xa8   :  { %124 = vrsqrt.f32 %v56_v21  ;;  %vm66_vm3 = vcmp.eq.f32.partialorder %v56_v21, inf  ;;  %v69_v30 = vand.u32 2147483648, %v56_v21  ;;  %vm68_vm4 = vcmp.eq.f32.partialorder %v56_v21, 0.0 }
  0xb1   :  { %v123_v22 = vpop.eup %122 }
  0xb2   :  { %v58_v23 = vmul.f32 %v123_v22, %v55_v18 }
  0xb4   :  { %v60_v25 = vsel %vm59_vm1, %v55_v18, %v58_v23 }
  0xb5   :  { %v63_v26 = vsel %vm61_vm2, %v62_v24, %v60_v25  ;;  %v125_v27 = vpop.eup %124 }
  0xb6   :  { %v71_v28 = vadd.f32 1e-06, %v63_v26  ;;  %v65_v29 = vmul.f32 %v125_v27, %v56_v21 }
  0xb8   :  { %126 = vrcp.f32 %v71_v28  ;;  %v67_v31 = vsel %vm66_vm3, %v56_v21, %v65_v29 }
  0xb9   :  { %v70_v32 = vsel %vm68_vm4, %v69_v30, %v67_v31 }
  0xba   :  { %v72_v33 = vadd.f32 1e-06, %v70_v32 }
  0xbc   :  { %128 = vrcp.f32 %v72_v33 }
  0xc5   :  { %v127_v35 = vpop.eup %126 }
  0xc6   :  { %v79_v37 = vmul.f32 %v127_v35, %v77_v34 }
  0xc8   :  { %v87_v39 = vmul.f32 %v116_v36, %v79_v37 }
  0xc9   :  { %v129_v41 = vpop.eup %128 }
  0xca   :  { %v95_v42 = vadd.f32 %v117_v38, %v87_v39  ;;  %v80_v43 = vmul.f32 %v129_v41, %v78_v40 }
  0xcc   :  { %97 = vst.msk [vmem:[#allocation5] sm:$0xff] %vm31_vm0, %v95_v42  ;;  %v88_v44 = vmul.f32 %v116_v36, %v80_v43 }
  0xce   :  { %v96_v45 = vadd.f32 %v117_v38, %v88_v44 }
  0xd0   :  { %98 = vst.msk [vmem:[#allocation5 + $0x8] sm:$0xff] %vm31_vm0, %v96_v45 }
  0xd1   :  { %161 = shalt.err (!%p158_p9)
}
  0xd2   :  { %110 = dma.vmem_to_hbm [thread:$0]  %s105_s23, 256, %s225_s3, [#allocation4], %s175_s15, %s175_s15, %s176_s16  }
  0xd3   :  { %172 = dma.done.wait [#allocation4], 256  }
  0xd4   :  { %173 = vsyncadd [#allocation4], 4294967040 }
  0xd5   :  { %114 = vsyncpa [#allocation3], 1 }
  0xd6   :  { %115 = vsyncpa [#allocation4], 1 }

</bundles_post_ra>
